<compile_context>
chip_gen: v5e
topology: v5e:2x2
jax: 0.10.0
libtpu: 0.0.40
codegen_flags: <defaults>
</compile_context>

<pallas_src>
import jax
import jax.numpy as jnp
from jax.experimental import pallas as pl
from jax.experimental.pallas import tpu as pltpu


def _round_up(x, m):
    return (x + m - 1) // m * m


def _rnn_kernel(emb_ref, w_ih_ref, w_hh_ref, b_ref, w_fc_ref, b_fc_ref,
                out_ref, pre_ref):
    """One invocation processes the whole padded (B, T) problem.

    emb_ref : (T*Bp, E)  time-major flattened timesteps (row = t*Bp + b)
    w_ih_ref: (E, Hp)    w_hh_ref: (Hp, Hp)   b_ref: (1, Hp) f32 (b_ih + b_hh)
    w_fc_ref: (Hp, Op)   b_fc_ref: (1, Op) f32
    out_ref : (Bp, Op) f32
    pre_ref : (T*Bp, Hp) f32 VMEM scratch (hoisted input projection, time-major)
    """
    Bp = out_ref.shape[0]
    Hp = w_hh_ref.shape[0]
    T = emb_ref.shape[0] // Bp
    cdt = w_hh_ref.dtype  # compute (matmul input) dtype: f32 (default) or bf16

    # (1) Hoisted input projection — independent of h, so it does not belong on
    #     the serial critical path.  One tall MXU matmul, bias folded in, f32
    #     accumulation.  Rows are time-major: row = t*Bp + b.
    pre_ref[...] = (
        jnp.dot(emb_ref[...], w_ih_ref[...], preferred_element_type=jnp.float32)
        + b_ref[...])

    # Loop-invariant recurrent weights: read once, stays resident across steps.
    w_hh = w_hh_ref[...]

    # (2) Serial recurrence: per step one (Bp, Hp) x (Hp, Hp) MXU matmul, a VPU
    #     add and an EUP tanh (tanh overlaps with the MXU push).
    def step(t, h):
        # Timestep t is a contiguous, 8-sublane-aligned slab of pre_ref.
        r0 = pl.multiple_of(t * Bp, Bp)
        p_t = pre_ref[pl.ds(r0, Bp), :]                             # (Bp, Hp) f32
        hh = jnp.dot(h.astype(cdt), w_hh, preferred_element_type=jnp.float32)
        return jnp.tanh(p_t + hh)                                   # f32 carry

    h0 = jnp.zeros((Bp, Hp), jnp.float32)   # torch init_hidden(): zeros
    h_last = jax.lax.fori_loop(0, T, step, h0, unroll=min(T, 8))

    # (3) fc applied to out[:, -1, :] == h_T ; lane-dense (Bp, Op) store.
    out_ref[...] = (
        jnp.dot(h_last.astype(cdt), w_fc_ref[...],
                preferred_element_type=jnp.float32)
        + b_fc_ref[...]).astype(out_ref.dtype)


def rnn_forward(x, emb_table, w_ih, w_hh, b_ih, b_hh, w_fc, b_fc,
                compute_dtype=jnp.float32):
    """x: [B, T] int32 token ids. Returns [B, output_size] float32.

    compute_dtype: dtype fed to the MXU (jnp.float32 or jnp.bfloat16);
    accumulation, biases and tanh stay in float32 either way.  Keep f32 on v5e
    (no bf16 VPU/EUP); bf16 only pays once W_hh bytes matter (H >= ~1024).
    """
    B, T = x.shape
    E = emb_table.shape[1]
    H = w_ih.shape[0]
    O = w_fc.shape[0]

    # Pad once to hardware tiles: batch -> sublane (8), hidden/out -> lane (128).
    Bp = _round_up(B, 8)
    Hp = _round_up(H, 128)
    Op = _round_up(O, 128)

    # Embedding gather stays in XLA (padding_idx row of emb_table is zero).
    # Time-major layout: timestep t of the projected activations becomes a
    # contiguous sublane-aligned slab inside the kernel.  The transpose is on a
    # few-KiB array here; at scale it would be fused into a T-chunked pipeline.
    emb = emb_table[x].astype(compute_dtype)                        # (B, T, E)
    emb = jnp.pad(emb, ((0, Bp - B), (0, 0), (0, 0)))               # (Bp, T, E)
    emb2d = jnp.transpose(emb, (1, 0, 2)).reshape(T * Bp, E)        # row = t*Bp + b

    # Pre-transpose + zero-pad weights so the kernel does plain row-major
    # matmuls on well-formed MXU tiles.  Zero padding is inert:
    # padded H columns of pre are 0 -> tanh(0) = 0 -> padded h stays 0;
    # padded batch rows / O columns are discarded by the final slice.
    w_ih_p = jnp.pad(w_ih.T.astype(compute_dtype), ((0, 0), (0, Hp - H)))        # (E, Hp)
    w_hh_p = jnp.pad(w_hh.T.astype(compute_dtype), ((0, Hp - H), (0, Hp - H)))   # (Hp, Hp)
    w_fc_p = jnp.pad(w_fc.T.astype(compute_dtype), ((0, Hp - H), (0, Op - O)))   # (Hp, Op)
    b_p = jnp.pad((b_ih + b_hh).astype(jnp.float32).reshape(1, H),
                  ((0, 0), (0, Hp - H)))                                         # (1, Hp)
    b_fc_p = jnp.pad(b_fc.astype(jnp.float32).reshape(1, O),
                     ((0, 0), (0, Op - O)))                                      # (1, Op)

    grid_spec = pltpu.PrefetchScalarGridSpec(
        num_scalar_prefetch=0,
        grid=(1,),   # single invocation; all timesteps handled in-kernel
        in_specs=[
            pl.BlockSpec((T * Bp, E), lambda i: (0, 0)),   # time-major activations
            pl.BlockSpec((E, Hp), lambda i: (0, 0)),       # W_ih^T
            pl.BlockSpec((Hp, Hp), lambda i: (0, 0)),      # W_hh^T
            pl.BlockSpec((1, Hp), lambda i: (0, 0)),       # b_ih + b_hh
            pl.BlockSpec((Hp, Op), lambda i: (0, 0)),      # W_fc^T
            pl.BlockSpec((1, Op), lambda i: (0, 0)),       # b_fc
        ],
        out_specs=pl.BlockSpec((Bp, Op), lambda i: (0, 0)),
        scratch_shapes=[pltpu.VMEM((T * Bp, Hp), jnp.float32)],  # hoisted pre_x
    )

    out_p = pl.pallas_call(
        _rnn_kernel,
        out_shape=jax.ShapeDtypeStruct((Bp, Op), jnp.float32),
        grid_spec=grid_spec,
        compiler_params=pltpu.CompilerParams(
            dimension_semantics=("arbitrary",),     # recurrence is sequential
            vmem_limit_bytes=16 * 1024 * 1024,      # fits v7x's 64 MiB VMEM too
        ),
    )(emb2d, w_ih_p, w_hh_p, b_p, w_fc_p, b_fc_p)

    return out_p[:B, :O]


def rnn_forward_ref(x, emb_table, w_ih, w_hh, b_ih, b_hh, w_fc, b_fc):
    """Pure-JAX f32 reference mirroring the torch module's semantics."""
    emb = emb_table[x]                               # (B, T, E)
    B = x.shape[0]
    H = w_ih.shape[0]
    h0 = jnp.zeros((B, H), jnp.float32)

    def step(h, x_t):
        h_new = jnp.tanh(x_t @ w_ih.T + b_ih + h @ w_hh.T + b_hh)
        return h_new, None

    h_T, _ = jax.lax.scan(step, h0, jnp.transpose(emb, (1, 0, 2)))
    return h_T @ w_fc.T + b_fc


if __name__ == "__main__":
    # Small shapes consistent with the module's forward.
    vocab_size = 32
    emb_size = 16
    padding_idx = 0
    hidden_size = 32
    output_size = 8
    B, T = 2, 8

    key = jax.random.PRNGKey(0)
    (k_x, k_emb, k_wih, k_whh, k_bih, k_bhh, k_wfc, k_bfc) = jax.random.split(key, 8)

    # Deterministic parameter init (shapes per nn.Embedding / nn.RNN / nn.Linear).
    emb_table = 0.1 * jax.random.normal(k_emb, (vocab_size, emb_size), jnp.float32)
    emb_table = emb_table.at[padding_idx].set(0.0)   # padding_idx row is zero
    w_ih = 0.1 * jax.random.normal(k_wih, (hidden_size, emb_size), jnp.float32)
    w_hh = 0.1 * jax.random.normal(k_whh, (hidden_size, hidden_size), jnp.float32)
    b_ih = 0.1 * jax.random.normal(k_bih, (hidden_size,), jnp.float32)
    b_hh = 0.1 * jax.random.normal(k_bhh, (hidden_size,), jnp.float32)
    w_fc = 0.1 * jax.random.normal(k_wfc, (output_size, hidden_size), jnp.float32)
    b_fc = 0.1 * jax.random.normal(k_bfc, (output_size,), jnp.float32)

    x = jax.random.randint(k_x, (B, T), 0, vocab_size, dtype=jnp.int32)

    ref = rnn_forward_ref(x, emb_table, w_ih, w_hh, b_ih, b_hh, w_fc, b_fc)

    # f32 path (default): exact-ish match to the reference.
    out_f32 = jax.block_until_ready(
        rnn_forward(x, emb_table, w_ih, w_hh, b_ih, b_hh, w_fc, b_fc))
    assert out_f32.shape == (B, output_size)
    assert jnp.allclose(out_f32, ref, atol=1e-5, rtol=1e-5), "f32 kernel mismatch"

    # Optional bf16 weights/activations with f32 accumulation (MXU fast path on
    # v6e/v7x; keep f32 on v5e for this size).
    out_bf16 = jax.block_until_ready(
        rnn_forward(x, emb_table, w_ih, w_hh, b_ih, b_hh, w_fc, b_fc,
                    compute_dtype=jnp.bfloat16))
    assert out_bf16.shape == (B, output_size)
    assert jnp.allclose(out_bf16, ref, atol=5e-2, rtol=0.0), "bf16 kernel mismatch"

    print("KERNEL_OK")
</pallas_src>

<mosaic_0001>
module attributes {stable_mosaic.version = 11 : i64} {
  func.func @_rnn_kernel(%arg0: i32, %arg1: memref<64x16xf32, #tpu.memory_space<vmem>>, %arg2: memref<16x128xf32, #tpu.memory_space<vmem>>, %arg3: memref<128x128xf32, #tpu.memory_space<vmem>>, %arg4: memref<1x128xf32, #tpu.memory_space<vmem>>, %arg5: memref<128x128xf32, #tpu.memory_space<vmem>>, %arg6: memref<1x128xf32, #tpu.memory_space<vmem>>, %arg7: memref<8x128xf32, #tpu.memory_space<vmem>>, %arg8: memref<64x128xf32, #tpu.memory_space<vmem>>) attributes {dimension_semantics = [#tpu.dimension_semantics<arbitrary>], iteration_bounds = array<i64: 1>, scalar_prefetch = 0 : i64, scratch_operands = 1 : i64, tpu.core_type = #tpu.core_type<tc>, window_params = [{pipeline_mode = #tpu.pipeline_mode<synchronous>, transform_indices = @transform_0, window_bounds = array<i64: 64, 16>}, {pipeline_mode = #tpu.pipeline_mode<synchronous>, transform_indices = @transform_1, window_bounds = array<i64: 16, 128>}, {pipeline_mode = #tpu.pipeline_mode<synchronous>, transform_indices = @transform_2, window_bounds = array<i64: 128, 128>}, {pipeline_mode = #tpu.pipeline_mode<synchronous>, transform_indices = @transform_3, window_bounds = array<i64: 1, 128>}, {pipeline_mode = #tpu.pipeline_mode<synchronous>, transform_indices = @transform_4, window_bounds = array<i64: 128, 128>}, {pipeline_mode = #tpu.pipeline_mode<synchronous>, transform_indices = @transform_5, window_bounds = array<i64: 1, 128>}, {pipeline_mode = #tpu.pipeline_mode<synchronous>, transform_indices = @transform_6, window_bounds = array<i64: 8, 128>}]} {
    %c0 = arith.constant 0 : index
    %c0_0 = arith.constant 0 : index
    %0 = vector.load %arg1[%c0, %c0_0] : memref<64x16xf32, #tpu.memory_space<vmem>>, vector<64x16xf32>
    %c0_1 = arith.constant 0 : index
    %c0_2 = arith.constant 0 : index
    %1 = vector.load %arg2[%c0_1, %c0_2] : memref<16x128xf32, #tpu.memory_space<vmem>>, vector<16x128xf32>
    %cst = arith.constant dense<0.000000e+00> : vector<64x128xf32>
    %2 = tpu.matmul %0, %1, %cst {dimension_numbers = #tpu.dot_dimension_numbers<[1], [0], [0], [1], [0, 0, 1, 1], [], []>} : vector<64x16xf32>, vector<16x128xf32>, vector<64x128xf32> -> vector<64x128xf32>
    %c0_3 = arith.constant 0 : index
    %c0_4 = arith.constant 0 : index
    %3 = vector.load %arg4[%c0_3, %c0_4] : memref<1x128xf32, #tpu.memory_space<vmem>>, vector<1x128xf32>
    %4 = vector.broadcast %3 : vector<1x128xf32> to vector<64x128xf32>
    %5 = arith.addf %2, %4 : vector<64x128xf32>
    %c0_5 = arith.constant 0 : index
    %c0_6 = arith.constant 0 : index
    %6 = vector.load %arg8[%c0_5, %c0_6] : memref<64x128xf32, #tpu.memory_space<vmem>>, vector<64x128xf32>
    tpu.vector_store %arg8[%c0_5, %c0_6], %5 {strides = array<i32>} : memref<64x128xf32, #tpu.memory_space<vmem>>, vector<64x128xf32>,
    %c0_7 = arith.constant 0 : index
    %c0_8 = arith.constant 0 : index
    %7 = vector.load %arg3[%c0_7, %c0_8] : memref<128x128xf32, #tpu.memory_space<vmem>>, vector<128x128xf32>
    %cst_9 = arith.constant 0.000000e+00 : f32
    %8 = vector.broadcast %cst_9 : f32 to vector<8x128xf32>
    %c0_i32 = arith.constant 0 : i32
    %c8_i32 = arith.constant 8 : i32
    %9 = arith.muli %c0_i32, %c8_i32 : i32
    %10 = tpu.assume_multiple %9, 8 : i32
    %11 = arith.index_cast %10 : i32 to index
    %c0_10 = arith.constant 0 : index
    %12 = vector.load %arg8[%11, %c0_10] : memref<64x128xf32, #tpu.memory_space<vmem>>, vector<8x128xf32>
    %cst_11 = arith.constant dense<0.000000e+00> : vector<8x128xf32>
    %13 = tpu.matmul %8, %7, %cst_11 {dimension_numbers = #tpu.dot_dimension_numbers<[1], [0], [0], [1], [0, 0, 1, 1], [], []>} : vector<8x128xf32>, vector<128x128xf32>, vector<8x128xf32> -> vector<8x128xf32>
    %14 = arith.addf %12, %13 : vector<8x128xf32>
    %15 = math.tanh %14 : vector<8x128xf32>
    %c1_i32 = arith.constant 1 : i32
    %c8_i32_12 = arith.constant 8 : i32
    %16 = arith.muli %c1_i32, %c8_i32_12 : i32
    %17 = tpu.assume_multiple %16, 8 : i32
    %18 = arith.index_cast %17 : i32 to index
    %c0_13 = arith.constant 0 : index
    %19 = vector.load %arg8[%18, %c0_13] : memref<64x128xf32, #tpu.memory_space<vmem>>, vector<8x128xf32>
    %cst_14 = arith.constant dense<0.000000e+00> : vector<8x128xf32>
    %20 = tpu.matmul %15, %7, %cst_14 {dimension_numbers = #tpu.dot_dimension_numbers<[1], [0], [0], [1], [0, 0, 1, 1], [], []>} : vector<8x128xf32>, vector<128x128xf32>, vector<8x128xf32> -> vector<8x128xf32>
    %21 = arith.addf %19, %20 : vector<8x128xf32>
    %22 = math.tanh %21 : vector<8x128xf32>
    %c2_i32 = arith.constant 2 : i32
    %c8_i32_15 = arith.constant 8 : i32
    %23 = arith.muli %c2_i32, %c8_i32_15 : i32
    %24 = tpu.assume_multiple %23, 8 : i32
    %25 = arith.index_cast %24 : i32 to index
    %c0_16 = arith.constant 0 : index
    %26 = vector.load %arg8[%25, %c0_16] : memref<64x128xf32, #tpu.memory_space<vmem>>, vector<8x128xf32>
    %cst_17 = arith.constant dense<0.000000e+00> : vector<8x128xf32>
    %27 = tpu.matmul %22, %7, %cst_17 {dimension_numbers = #tpu.dot_dimension_numbers<[1], [0], [0], [1], [0, 0, 1, 1], [], []>} : vector<8x128xf32>, vector<128x128xf32>, vector<8x128xf32> -> vector<8x128xf32>
    %28 = arith.addf %26, %27 : vector<8x128xf32>
    %29 = math.tanh %28 : vector<8x128xf32>
    %c3_i32 = arith.constant 3 : i32
    %c8_i32_18 = arith.constant 8 : i32
    %30 = arith.muli %c3_i32, %c8_i32_18 : i32
    %31 = tpu.assume_multiple %30, 8 : i32
    %32 = arith.index_cast %31 : i32 to index
    %c0_19 = arith.constant 0 : index
    %33 = vector.load %arg8[%32, %c0_19] : memref<64x128xf32, #tpu.memory_space<vmem>>, vector<8x128xf32>
    %cst_20 = arith.constant dense<0.000000e+00> : vector<8x128xf32>
    %34 = tpu.matmul %29, %7, %cst_20 {dimension_numbers = #tpu.dot_dimension_numbers<[1], [0], [0], [1], [0, 0, 1, 1], [], []>} : vector<8x128xf32>, vector<128x128xf32>, vector<8x128xf32> -> vector<8x128xf32>
    %35 = arith.addf %33, %34 : vector<8x128xf32>
    %36 = math.tanh %35 : vector<8x128xf32>
    %c4_i32 = arith.constant 4 : i32
    %c8_i32_21 = arith.constant 8 : i32
    %37 = arith.muli %c4_i32, %c8_i32_21 : i32
    %38 = tpu.assume_multiple %37, 8 : i32
    %39 = arith.index_cast %38 : i32 to index
    %c0_22 = arith.constant 0 : index
    %40 = vector.load %arg8[%39, %c0_22] : memref<64x128xf32, #tpu.memory_space<vmem>>, vector<8x128xf32>
    %cst_23 = arith.constant dense<0.000000e+00> : vector<8x128xf32>
    %41 = tpu.matmul %36, %7, %cst_23 {dimension_numbers = #tpu.dot_dimension_numbers<[1], [0], [0], [1], [0, 0, 1, 1], [], []>} : vector<8x128xf32>, vector<128x128xf32>, vector<8x128xf32> -> vector<8x128xf32>
    %42 = arith.addf %40, %41 : vector<8x128xf32>
    %43 = math.tanh %42 : vector<8x128xf32>
    %c5_i32 = arith.constant 5 : i32
    %c8_i32_24 = arith.constant 8 : i32
    %44 = arith.muli %c5_i32, %c8_i32_24 : i32
    %45 = tpu.assume_multiple %44, 8 : i32
    %46 = arith.index_cast %45 : i32 to index
    %c0_25 = arith.constant 0 : index
    %47 = vector.load %arg8[%46, %c0_25] : memref<64x128xf32, #tpu.memory_space<vmem>>, vector<8x128xf32>
    %cst_26 = arith.constant dense<0.000000e+00> : vector<8x128xf32>
    %48 = tpu.matmul %43, %7, %cst_26 {dimension_numbers = #tpu.dot_dimension_numbers<[1], [0], [0], [1], [0, 0, 1, 1], [], []>} : vector<8x128xf32>, vector<128x128xf32>, vector<8x128xf32> -> vector<8x128xf32>
    %49 = arith.addf %47, %48 : vector<8x128xf32>
    %50 = math.tanh %49 : vector<8x128xf32>
    %c6_i32 = arith.constant 6 : i32
    %c8_i32_27 = arith.constant 8 : i32
    %51 = arith.muli %c6_i32, %c8_i32_27 : i32
    %52 = tpu.assume_multiple %51, 8 : i32
    %53 = arith.index_cast %52 : i32 to index
    %c0_28 = arith.constant 0 : index
    %54 = vector.load %arg8[%53, %c0_28] : memref<64x128xf32, #tpu.memory_space<vmem>>, vector<8x128xf32>
    %cst_29 = arith.constant dense<0.000000e+00> : vector<8x128xf32>
    %55 = tpu.matmul %50, %7, %cst_29 {dimension_numbers = #tpu.dot_dimension_numbers<[1], [0], [0], [1], [0, 0, 1, 1], [], []>} : vector<8x128xf32>, vector<128x128xf32>, vector<8x128xf32> -> vector<8x128xf32>
    %56 = arith.addf %54, %55 : vector<8x128xf32>
    %57 = math.tanh %56 : vector<8x128xf32>
    %c7_i32 = arith.constant 7 : i32
    %c8_i32_30 = arith.constant 8 : i32
    %58 = arith.muli %c7_i32, %c8_i32_30 : i32
    %59 = tpu.assume_multiple %58, 8 : i32
    %60 = arith.index_cast %59 : i32 to index
    %c0_31 = arith.constant 0 : index
    %61 = vector.load %arg8[%60, %c0_31] : memref<64x128xf32, #tpu.memory_space<vmem>>, vector<8x128xf32>
    %cst_32 = arith.constant dense<0.000000e+00> : vector<8x128xf32>
    %62 = tpu.matmul %57, %7, %cst_32 {dimension_numbers = #tpu.dot_dimension_numbers<[1], [0], [0], [1], [0, 0, 1, 1], [], []>} : vector<8x128xf32>, vector<128x128xf32>, vector<8x128xf32> -> vector<8x128xf32>
    %63 = arith.addf %61, %62 : vector<8x128xf32>
    %64 = math.tanh %63 : vector<8x128xf32>
    %c8_i32_33 = arith.constant 8 : i32
    %c0_34 = arith.constant 0 : index
    %c0_35 = arith.constant 0 : index
    %65 = vector.load %arg5[%c0_34, %c0_35] : memref<128x128xf32, #tpu.memory_space<vmem>>, vector<128x128xf32>
    %cst_36 = arith.constant dense<0.000000e+00> : vector<8x128xf32>
    %66 = tpu.matmul %64, %65, %cst_36 {dimension_numbers = #tpu.dot_dimension_numbers<[1], [0], [0], [1], [0, 0, 1, 1], [], []>} : vector<8x128xf32>, vector<128x128xf32>, vector<8x128xf32> -> vector<8x128xf32>
    %c0_37 = arith.constant 0 : index
    %c0_38 = arith.constant 0 : index
    %67 = vector.load %arg6[%c0_37, %c0_38] : memref<1x128xf32, #tpu.memory_space<vmem>>, vector<1x128xf32>
    %68 = vector.broadcast %67 : vector<1x128xf32> to vector<8x128xf32>
    %69 = arith.addf %66, %68 : vector<8x128xf32>
    %c0_39 = arith.constant 0 : index
    %c0_40 = arith.constant 0 : index
    %70 = vector.load %arg7[%c0_39, %c0_40] : memref<8x128xf32, #tpu.memory_space<vmem>>, vector<8x128xf32>
    tpu.vector_store %arg7[%c0_39, %c0_40], %69 {strides = array<i32>} : memref<8x128xf32, #tpu.memory_space<vmem>>, vector<8x128xf32>,
    return
  }
  func.func @transform_0(%arg0: i32) -> (i32, i32) {
    %c0_i32 = arith.constant 0 : i32
    %c0_i32_0 = arith.constant 0 : i32
    %c0_i32_1 = arith.constant 0 : i32
    return %c0_i32, %c0_i32_0 : i32, i32
  }
  func.func @transform_1(%arg0: i32) -> (i32, i32) {
    %c0_i32 = arith.constant 0 : i32
    %c0_i32_0 = arith.constant 0 : i32
    %c0_i32_1 = arith.constant 0 : i32
    return %c0_i32, %c0_i32_0 : i32, i32
  }
  func.func @transform_2(%arg0: i32) -> (i32, i32) {
    %c0_i32 = arith.constant 0 : i32
    %c0_i32_0 = arith.constant 0 : i32
    %c0_i32_1 = arith.constant 0 : i32
    return %c0_i32, %c0_i32_0 : i32, i32
  }
  func.func @transform_3(%arg0: i32) -> (i32, i32) {
    %c0_i32 = arith.constant 0 : i32
    %c0_i32_0 = arith.constant 0 : i32
    %c0_i32_1 = arith.constant 0 : i32
    return %c0_i32, %c0_i32_0 : i32, i32
  }
  func.func @transform_4(%arg0: i32) -> (i32, i32) {
    %c0_i32 = arith.constant 0 : i32
    %c0_i32_0 = arith.constant 0 : i32
    %c0_i32_1 = arith.constant 0 : i32
    return %c0_i32, %c0_i32_0 : i32, i32
  }
  func.func @transform_5(%arg0: i32) -> (i32, i32) {
    %c0_i32 = arith.constant 0 : i32
    %c0_i32_0 = arith.constant 0 : i32
    %c0_i32_1 = arith.constant 0 : i32
    return %c0_i32, %c0_i32_0 : i32, i32
  }
  func.func @transform_6(%arg0: i32) -> (i32, i32) {
    %c0_i32 = arith.constant 0 : i32
    %c0_i32_0 = arith.constant 0 : i32
    %c0_i32_1 = arith.constant 0 : i32
    return %c0_i32, %c0_i32_0 : i32, i32
  }
}

</mosaic_0001>

<bundles_post_ra>
// kernel: tpu_custom_call.1
= control target key start
LH: loop header
LB: loop body
LE: loop exit
PB: predicated region body
PF: predicated region fallthrough
CT: control target
= control target key end

     0   :  { %11 = vsyncpa [#allocation4], 0  ;;  %s784_s0 = inlined_call_operand.vmem [shape: f32[64,16], index: 0, kind: input, shape index: {}]   ;;  %s785_s1 = inlined_call_operand.vmem [shape: f32[16,128], index: 1, kind: input, shape index: {}]   ;;  %s786_s2 = inlined_call_operand.hbm [shape: f32[128,128], index: 2, kind: input, shape index: {}]   ;;  %s787_s3 = inlined_call_operand.vmem [shape: f32[1,128], index: 3, kind: input, shape index: {}]   ;;  %s788_s4 = inlined_call_operand.hbm [shape: f32[128,128], index: 4, kind: input, shape index: {}]   ;;  %s789_s5 = inlined_call_operand.vmem [shape: f32[1,128], index: 5, kind: input, shape index: {}]   ;;  %s790_s6 = inlined_call_operand.hbm [shape: f32[8,128], index: 6, kind: output, shape index: {}]  }
   0x1   :  { %12 = vsyncpa [#allocation7], 0 }
   0x2   :  { %13 = vsyncpa [#allocation5], 0  ;;  %s22_s23 = sshll.u32 %s786_s2, 4  ;;  %s520_s24 = smov [#allocation3]   ;;  %s23_s23 = int_to_ptr.hbm [resolvable:$true] %s22_s23 }
   0x3   :  { %s24_s25 = sshll.u32 %s520_s24, 4  ;;  %s37_s28 = sshll.u32 %s788_s4, 4  ;;  %s25_s25 = int_to_ptr.vmem [resolvable:$true] %s24_s25  ;;  %s38_s28 = int_to_ptr.hbm [resolvable:$true] %s37_s28 }
   0x4   :  { %s521_s29 = smov 128   ;;  %s522_s30 = smov 8  }
   0x5   :  { %30 = dma.hbm_to_vmem [thread:$0]  %s23_s23, 2048, %s25_s25, [#allocation4], %s521_s29, %s521_s29, %s522_s30  }
   0x6   :  { %s523_s7 = smov [#allocation6]  }
   0x7   :  { %s39_s8 = sshll.u32 %s523_s7, 4  ;;  %s40_s8 = int_to_ptr.vmem [resolvable:$true] %s39_s8 }
   0x8   :  { %45 = dma.hbm_to_vmem [thread:$0]  %s38_s28, 2048, %s40_s8, [#allocation7], %s521_s29, %s521_s29, %s522_s30  }
   0x9   :  { %514 = dma.done.wait [#allocation4], 2048  }
   0xa   :  { %515 = vsyncadd [#allocation4], 4294965248 }
   0xb   :  { %516 = dma.done.wait [#allocation7], 2048  }
   0xc   :  { %517 = vsyncadd [#allocation7], 4294965248  ;;  %v567_v0 = vld [vmem:[#allocation3 + $0x78] sm:$0xff]  ;;  %v569_v1 = vld [vmem:[#allocation3 + $0x70] sm:$0xff]  ;;  %vm70_vm0 = vcmask 130048   ;;  %v524_v19 = vmov 0.0  }
   0xd   :  { %161 = vmatpush.msra.mxu1 %v567_v0  ;;  %185 = vmatpush.msra.mxu2 %v567_v0  ;;  %v573_v2 = vld [vmem:[#allocation3 + $0x68] sm:$0xff]  ;;  %v578_v3 = vld [vmem:[#allocation3 + $0x60] sm:$0xff]  ;;  %v591_v7 = vld [vmem:[#allocation3 + $0x58] sm:$0xff]  ;;  %s525_s28 = smov [#allocation8]   ;;  %s399_s8 = sshll.u32 %s790_s6, 4  ;;  %s400_s8 = int_to_ptr.hbm [resolvable:$true] %s399_s8 }
   0xe   :  { %209 = vmatpush.msra.mxu3 %v567_v0  ;;  %v65_v4 = vld [vmem:[%s785_s1 + $0x8] sm:$0xff]  ;;  %v64_v5 = vld [vmem:[%s785_s1] sm:$0xff]  ;;  %v596_v8 = vld [vmem:[#allocation3 + $0x50] sm:$0xff]  ;;  %s397_s29 = sshll.u32 %s525_s28, 4  ;;  %s398_s29 = int_to_ptr.vmem [resolvable:$true] %s397_s29 }
   0xf   :  { %162 = vmatpush.msra.mxu1 %v569_v1  ;;  %186 = vmatpush.msra.mxu2 %v569_v1  ;;  %v56_v6 = vld [vmem:[%s784_s0] sm:$0xff]  ;;  %v602_v9 = vld [vmem:[#allocation3 + $0x48] sm:$0xff]  ;;  %v614_v11 = vld [vmem:[#allocation3 + $0x38] sm:$0xff] }
  0x10   :  { %210 = vmatpush.msra.mxu3 %v569_v1  ;;  %109 = vmatpush.msra.mxu0 %v65_v4  ;;  %v608_v10 = vld [vmem:[#allocation3 + $0x40] sm:$0xff]  ;;  %v620_v12 = vld [vmem:[#allocation3 + $0x30] sm:$0xff]  ;;  %v626_v13 = vld [vmem:[#allocation3 + $0x28] sm:$0xff] }
  0x11   :  { %163 = vmatpush.msra.mxu1 %v573_v2  ;;  %187 = vmatpush.msra.mxu2 %v573_v2  ;;  %v632_v14 = vld [vmem:[#allocation3 + $0x20] sm:$0xff]  ;;  %v638_v15 = vld [vmem:[#allocation3 + $0x18] sm:$0xff]  ;;  %v644_v16 = vld [vmem:[#allocation3 + $0x10] sm:$0xff] }
  0x12   :  { %211 = vmatpush.msra.mxu3 %v573_v2  ;;  %110 = vmatpush.msra.mxu0 %v64_v5  ;;  %v650_v17 = vld [vmem:[#allocation3 + $0x8] sm:$0xff]  ;;  %v656_v18 = vld [vmem:[#allocation3] sm:$0xff]  ;;  %v58_v27 = vld [vmem:[%s784_s0 + $0x10] sm:$0xff] }
  0x13   :  { %164 = vmatpush.msra.mxu1 %v578_v3  ;;  %410 = vmatmul.msk.f32.vlgmr.msra.gmra.mxu0 %vm70_vm0, %v56_v6  ;;  %v57_v20 = vld [vmem:[%s784_s0 + $0x8] sm:$0xff]  ;;  %v744_v21 = vld [vmem:[%s787_s3] ss:$0 sm:$0xff]  ;;  %v59_v33 = vld [vmem:[%s784_s0 + $0x18] sm:$0xff] }
  0x14   :  { %188 = vmatpush.msra.mxu2 %v578_v3  ;;  %212 = vmatpush.msra.mxu3 %v578_v3  ;;  %v60_v39 = vld [vmem:[%s784_s0 + $0x20] sm:$0xff]  ;;  %v61_v45 = vld [vmem:[%s784_s0 + $0x28] sm:$0xff]  ;;  %v62_v46 = vld [vmem:[%s784_s0 + $0x30] sm:$0xff] }
  0x15   :  { %165 = vmatpush.msra.mxu1 %v591_v7  ;;  %305 = vmatpush.msrb.mxu0 %v567_v0  ;;  %v63_v52 = vld [vmem:[%s784_s0 + $0x38] sm:$0xff]  ;;  %v365_v59 = vld [vmem:[#allocation6 + $0x70] sm:$0xff]  ;;  %v364_v61 = vld [vmem:[#allocation6 + $0x68] sm:$0xff] }
  0x16   :  { %189 = vmatpush.msra.mxu2 %v591_v7  ;;  %213 = vmatpush.msra.mxu3 %v591_v7  ;;  %v366_v58 = vld [vmem:[#allocation6 + $0x78] sm:$0xff]  ;;  %v363_v62 = vld [vmem:[#allocation6 + $0x60] sm:$0xff]  ;;  %v357_v5 = vld [vmem:[#allocation6 + $0x30] sm:$0xff] }
  0x17   :  { %166 = vmatpush.msra.mxu1 %v596_v8  ;;  %306 = vmatpush.msrb.mxu0 %v569_v1  ;;  %v362_v63 = vld [vmem:[#allocation6 + $0x58] sm:$0xff]  ;;  %v356_v6 = vld [vmem:[#allocation6 + $0x28] sm:$0xff] }
  0x18   :  { %190 = vmatpush.msra.mxu2 %v596_v8  ;;  %214 = vmatpush.msra.mxu3 %v596_v8  ;;  %v358_v4 = vld [vmem:[#allocation6 + $0x38] sm:$0xff] }
  0x19   :  { %167 = vmatpush.msra.mxu1 %v602_v9  ;;  %307 = vmatpush.msrb.mxu0 %v573_v2 }
  0x1a   :  { %191 = vmatpush.msra.mxu2 %v602_v9  ;;  %215 = vmatpush.msra.mxu3 %v602_v9 }
  0x1b   :  { %168 = vmatpush.msra.mxu1 %v608_v10  ;;  %308 = vmatpush.msrb.mxu0 %v578_v3 }
  0x1c   :  { %192 = vmatpush.msra.mxu2 %v608_v10  ;;  %216 = vmatpush.msra.mxu3 %v608_v10 }
  0x1d   :  { %169 = vmatpush.msra.mxu1 %v614_v11  ;;  %309 = vmatpush.msrb.mxu0 %v591_v7 }
  0x1e   :  { %193 = vmatpush.msra.mxu2 %v614_v11  ;;  %217 = vmatpush.msra.mxu3 %v614_v11 }
  0x1f   :  { %170 = vmatpush.msra.mxu1 %v620_v12  ;;  %310 = vmatpush.msrb.mxu0 %v596_v8 }
  0x20   :  { %194 = vmatpush.msra.mxu2 %v620_v12  ;;  %218 = vmatpush.msra.mxu3 %v620_v12 }
  0x21   :  { %171 = vmatpush.msra.mxu1 %v626_v13  ;;  %311 = vmatpush.msrb.mxu0 %v602_v9 }
  0x22   :  { %195 = vmatpush.msra.mxu2 %v626_v13  ;;  %219 = vmatpush.msra.mxu3 %v626_v13 }
  0x23   :  { %172 = vmatpush.msra.mxu1 %v632_v14  ;;  %312 = vmatpush.msrb.mxu0 %v608_v10 }
  0x24   :  { %196 = vmatpush.msra.mxu2 %v632_v14  ;;  %220 = vmatpush.msra.mxu3 %v632_v14 }
  0x25   :  { %173 = vmatpush.msra.mxu1 %v638_v15  ;;  %313 = vmatpush.msrb.mxu0 %v614_v11 }
  0x26   :  { %197 = vmatpush.msra.mxu2 %v638_v15  ;;  %221 = vmatpush.msra.mxu3 %v638_v15 }
  0x27   :  { %174 = vmatpush.msra.mxu1 %v644_v16  ;;  %314 = vmatpush.msrb.mxu0 %v620_v12 }
  0x28   :  { %198 = vmatpush.msra.mxu2 %v644_v16  ;;  %222 = vmatpush.msra.mxu3 %v644_v16 }
  0x29   :  { %175 = vmatpush.msra.mxu1 %v650_v17  ;;  %315 = vmatpush.msrb.mxu0 %v626_v13 }
  0x2a   :  { %199 = vmatpush.msra.mxu2 %v650_v17  ;;  %223 = vmatpush.msra.mxu3 %v650_v17 }
  0x2b   :  { %176 = vmatpush.msra.mxu1 %v656_v18  ;;  %316 = vmatpush.msrb.mxu0 %v632_v14 }
  0x2c   :  { %177 = vmatmul.f32.vlgmr.msra.gmra.mxu1 %v524_v19  ;;  %200 = vmatpush.msra.mxu2 %v656_v18 }
  0x2d   :  { %224 = vmatpush.msra.mxu3 %v656_v18  ;;  %233 = vmatpush.msrb.mxu1 %v567_v0 }
  0x2e   :  { %257 = vmatpush.msrb.mxu2 %v567_v0  ;;  %317 = vmatpush.msrb.mxu0 %v638_v15 }
  0x2f   :  { %281 = vmatpush.msrb.mxu3 %v567_v0  ;;  %234 = vmatpush.msrb.mxu1 %v569_v1 }
  0x30   :  { %258 = vmatpush.msrb.mxu2 %v569_v1  ;;  %318 = vmatpush.msrb.mxu0 %v644_v16 }
  0x31   :  { %282 = vmatpush.msrb.mxu3 %v569_v1  ;;  %235 = vmatpush.msrb.mxu1 %v573_v2 }
  0x32   :  { %259 = vmatpush.msrb.mxu2 %v573_v2  ;;  %319 = vmatpush.msrb.mxu0 %v650_v17 }
  0x33   :  { %283 = vmatpush.msrb.mxu3 %v573_v2  ;;  %236 = vmatpush.msrb.mxu1 %v578_v3 }
  0x34   :  { %260 = vmatpush.msrb.mxu2 %v578_v3  ;;  %320 = vmatpush.msrb.mxu0 %v656_v18 }
  0x35   :  { %284 = vmatpush.msrb.mxu3 %v578_v3  ;;  %237 = vmatpush.msrb.mxu1 %v591_v7 }
  0x36   :  { %261 = vmatpush.msrb.mxu2 %v591_v7  ;;  %411 = vmatmul.msk.f32.gmra.mxu0 %vm70_vm0, %v57_v20  ;;  %v425_v20 = vld [vmem:[%s789_s5] ss:$0 sm:$0xff] }
  0x37   :  { %285 = vmatpush.msrb.mxu3 %v591_v7  ;;  %238 = vmatpush.msrb.mxu1 %v596_v8 }
  0x38   :  { %262 = vmatpush.msrb.mxu2 %v596_v8 }
  0x39   :  { %286 = vmatpush.msrb.mxu3 %v596_v8  ;;  %239 = vmatpush.msrb.mxu1 %v602_v9 }
  0x3a   :  { %263 = vmatpush.msrb.mxu2 %v602_v9 }
  0x3b   :  { %287 = vmatpush.msrb.mxu3 %v602_v9  ;;  %240 = vmatpush.msrb.mxu1 %v608_v10 }
  0x3c   :  { %264 = vmatpush.msrb.mxu2 %v608_v10 }
  0x3d   :  { %288 = vmatpush.msrb.mxu3 %v608_v10  ;;  %241 = vmatpush.msrb.mxu1 %v614_v11 }
  0x3e   :  { %265 = vmatpush.msrb.mxu2 %v614_v11  ;;  %412 = vmatmul.msk.f32.gmra.mxu0 %vm70_vm0, %v58_v27 }
  0x3f   :  { %289 = vmatpush.msrb.mxu3 %v614_v11  ;;  %242 = vmatpush.msrb.mxu1 %v620_v12 }
  0x40   :  { %266 = vmatpush.msrb.mxu2 %v620_v12 }
  0x41   :  { %290 = vmatpush.msrb.mxu3 %v620_v12  ;;  %243 = vmatpush.msrb.mxu1 %v626_v13 }
  0x42   :  { %267 = vmatpush.msrb.mxu2 %v626_v13 }
  0x43   :  { %291 = vmatpush.msrb.mxu3 %v626_v13  ;;  %244 = vmatpush.msrb.mxu1 %v632_v14 }
  0x44   :  { %268 = vmatpush.msrb.mxu2 %v632_v14 }
  0x45   :  { %292 = vmatpush.msrb.mxu3 %v632_v14  ;;  %245 = vmatpush.msrb.mxu1 %v638_v15 }
  0x46   :  { %269 = vmatpush.msrb.mxu2 %v638_v15  ;;  %413 = vmatmul.msk.f32.gmra.mxu0 %vm70_vm0, %v59_v33 }
  0x47   :  { %293 = vmatpush.msrb.mxu3 %v638_v15  ;;  %246 = vmatpush.msrb.mxu1 %v644_v16 }
  0x48   :  { %270 = vmatpush.msrb.mxu2 %v644_v16 }
  0x49   :  { %294 = vmatpush.msrb.mxu3 %v644_v16  ;;  %247 = vmatpush.msrb.mxu1 %v650_v17 }
  0x4a   :  { %271 = vmatpush.msrb.mxu2 %v650_v17 }
  0x4b   :  { %295 = vmatpush.msrb.mxu3 %v650_v17  ;;  %248 = vmatpush.msrb.mxu1 %v656_v18 }
  0x4c   :  { %272 = vmatpush.msrb.mxu2 %v656_v18 }
  0x4d   :  { %296 = vmatpush.msrb.mxu3 %v656_v18  ;;  %329 = vmatpush.msra.mxu1 %v567_v0  ;;  %v361_v0 = vld [vmem:[#allocation6 + $0x50] sm:$0xff] }
  0x4e   :  { %414 = vmatmul.msk.f32.gmra.mxu0 %vm70_vm0, %v60_v39 }
  0x4f   :  { %330 = vmatpush.msra.mxu1 %v569_v1  ;;  %v360_v1 = vld [vmem:[#allocation6 + $0x48] sm:$0xff] }
  0x51   :  { %331 = vmatpush.msra.mxu1 %v573_v2 }
  0x53   :  { %332 = vmatpush.msra.mxu1 %v578_v3  ;;  %v359_v3 = vld [vmem:[#allocation6 + $0x40] sm:$0xff] }
  0x55   :  { %333 = vmatpush.msra.mxu1 %v591_v7 }
  0x56   :  { %415 = vmatmul.msk.f32.gmra.mxu0 %vm70_vm0, %v61_v45 }
  0x57   :  { %334 = vmatpush.msra.mxu1 %v596_v8 }
  0x59   :  { %335 = vmatpush.msra.mxu1 %v602_v9 }
  0x5b   :  { %336 = vmatpush.msra.mxu1 %v608_v10 }
  0x5d   :  { %337 = vmatpush.msra.mxu1 %v614_v11  ;;  %v355_v11 = vld [vmem:[#allocation6 + $0x20] sm:$0xff] }
  0x5e   :  { %416 = vmatmul.msk.f32.gmra.mxu0 %vm70_vm0, %v62_v46 }
  0x5f   :  { %338 = vmatpush.msra.mxu1 %v620_v12  ;;  %v354_v12 = vld [vmem:[#allocation6 + $0x18] sm:$0xff] }
  0x61   :  { %339 = vmatpush.msra.mxu1 %v626_v13  ;;  %v353_v13 = vld [vmem:[#allocation6 + $0x10] sm:$0xff] }
  0x63   :  { %340 = vmatpush.msra.mxu1 %v632_v14  ;;  %v352_v14 = vld [vmem:[#allocation6 + $0x8] sm:$0xff] }
  0x65   :  { %341 = vmatpush.msra.mxu1 %v638_v15  ;;  %v351_v15 = vld [vmem:[#allocation6] sm:$0xff] }
  0x66   :  { %417 = vmatmul.msk.f32.gmra.mxu0 %vm70_vm0, %v63_v52 }
  0x67   :  { %342 = vmatpush.msra.mxu1 %v644_v16 }
  0x69   :  { %343 = vmatpush.msra.mxu1 %v650_v17 }
  0x6b   :  { %344 = vmatpush.msra.mxu1 %v656_v18 }
  0x90   :  { %v112_v22 = vpop.f32.mrf.mxu0 }
  0x91   :  { %v113_v23 = vadd.f32 %v744_v21, %v112_v22 }
  0xa9   :  { %v178_v24 = vpop.f32.mrf.mxu1 }
  0xaa   :  { %v181_v25 = vadd.f32 %v178_v24, %v113_v23 }
  0xac   :  { %426 = vtanh.f32 %v181_v25 }
  0xb2   :  { %v427_v26 = vpop.eup %426 }
  0xb3   :  { %201 = vmatmul.f32.vlgmr.msra.gmra.mxu2 %v427_v26  ;;  %v115_v28 = vpop.f32.mrf.mxu0 }
  0xb4   :  { %v116_v29 = vadd.f32 %v744_v21, %v115_v28  ;;  %371 = vmatpush.msra.mxu2 %v366_v58 }
  0xb6   :  { %372 = vmatpush.msra.mxu2 %v365_v59 }
  0xb8   :  { %373 = vmatpush.msra.mxu2 %v364_v61 }
  0xba   :  { %374 = vmatpush.msra.mxu2 %v363_v62 }
  0xbb   :  { %v118_v34 = vpop.f32.mrf.mxu0 }
  0xbc   :  { %v119_v35 = vadd.f32 %v744_v21, %v118_v34  ;;  %375 = vmatpush.msra.mxu2 %v362_v63 }
  0xbe   :  { %376 = vmatpush.msra.mxu2 %v361_v0 }
  0xc0   :  { %377 = vmatpush.msra.mxu2 %v360_v1 }
  0xc2   :  { %378 = vmatpush.msra.mxu2 %v359_v3 }
  0xc3   :  { %v121_v40 = vpop.f32.mrf.mxu0 }
  0xc4   :  { %v122_v41 = vadd.f32 %v744_v21, %v121_v40  ;;  %379 = vmatpush.msra.mxu2 %v358_v4 }
  0xc6   :  { %380 = vmatpush.msra.mxu2 %v357_v5 }
  0xc8   :  { %381 = vmatpush.msra.mxu2 %v356_v6 }
  0xca   :  { %382 = vmatpush.msra.mxu2 %v355_v11 }
  0xcb   :  { %v124_v47 = vpop.f32.mrf.mxu0 }
  0xcc   :  { %v125_v48 = vadd.f32 %v744_v21, %v124_v47  ;;  %383 = vmatpush.msra.mxu2 %v354_v12 }
  0xce   :  { %384 = vmatpush.msra.mxu2 %v353_v13 }
  0xd0   :  { %385 = vmatpush.msra.mxu2 %v352_v14 }
  0xd2   :  { %386 = vmatpush.msra.mxu2 %v351_v15 }
  0xd3   :  { %v127_v53 = vpop.f32.mrf.mxu0 }
  0xd4   :  { %v128_v54 = vadd.f32 %v744_v21, %v127_v53 }
  0xdb   :  { %v130_v60 = vpop.f32.mrf.mxu0 }
  0xdc   :  { %v131_v7 = vadd.f32 %v744_v21, %v130_v60 }
  0xe3   :  { %v133_v2 = vpop.f32.mrf.mxu0 }
  0xe4   :  { %v134_v16 = vadd.f32 %v744_v21, %v133_v2 }
 0x136   :  { %v202_v30 = vpop.f32.mrf.mxu2 }
 0x137   :  { %v205_v31 = vadd.f32 %v202_v30, %v116_v29 }
 0x139   :  { %428 = vtanh.f32 %v205_v31 }
 0x13f   :  { %v429_v32 = vpop.eup %428 }
 0x140   :  { %225 = vmatmul.f32.vlgmr.msra.gmra.mxu3 %v429_v32 }
 0x1c3   :  { %v226_v36 = vpop.f32.mrf.mxu3 }
 0x1c4   :  { %v229_v37 = vadd.f32 %v226_v36, %v119_v35 }
 0x1c6   :  { %430 = vtanh.f32 %v229_v37 }
 0x1cc   :  { %v431_v38 = vpop.eup %430 }
 0x1cd   :  { %249 = vmatmul.f32.vlgmr.msrb.gmra.mxu1 %v431_v38 }
 0x24a   :  { %v250_v42 = vpop.f32.mrf.mxu1 }
 0x24b   :  { %v253_v43 = vadd.f32 %v250_v42, %v122_v41 }
 0x24d   :  { %432 = vtanh.f32 %v253_v43 }
 0x253   :  { %v433_v44 = vpop.eup %432 }
 0x254   :  { %273 = vmatmul.f32.vlgmr.msrb.gmra.mxu2 %v433_v44 }
 0x2d7   :  { %v274_v49 = vpop.f32.mrf.mxu2 }
 0x2d8   :  { %v277_v50 = vadd.f32 %v274_v49, %v125_v48 }
 0x2da   :  { %434 = vtanh.f32 %v277_v50 }
 0x2e0   :  { %v435_v51 = vpop.eup %434 }
 0x2e1   :  { %297 = vmatmul.f32.vlgmr.msrb.gmra.mxu3 %v435_v51 }
 0x364   :  { %v298_v55 = vpop.f32.mrf.mxu3 }
 0x365   :  { %v301_v56 = vadd.f32 %v298_v55, %v128_v54 }
 0x367   :  { %436 = vtanh.f32 %v301_v56 }
 0x36d   :  { %v437_v57 = vpop.eup %436 }
 0x36e   :  { %321 = vmatmul.f32.vlgmr.msrb.gmra.mxu0 %v437_v57 }
 0x3eb   :  { %v322_v8 = vpop.f32.mrf.mxu0 }
 0x3ec   :  { %v325_v9 = vadd.f32 %v322_v8, %v131_v7 }
 0x3ee   :  { %438 = vtanh.f32 %v325_v9 }
 0x3f4   :  { %v439_v10 = vpop.eup %438 }
 0x3f5   :  { %345 = vmatmul.f32.vlgmr.msra.gmra.mxu1 %v439_v10 }
 0x472   :  { %v346_v17 = vpop.f32.mrf.mxu1 }
 0x473   :  { %v349_v18 = vadd.f32 %v346_v17, %v134_v16 }
 0x475   :  { %440 = vtanh.f32 %v349_v18 }
 0x47b   :  { %v441_v19 = vpop.eup %440 }
 0x47c   :  { %387 = vmatmul.f32.vlgmr.msra.gmra.mxu2 %v441_v19 }
 0x4ff   :  { %v388_v22 = vpop.f32.mrf.mxu2 }
 0x500   :  { %v389_v23 = vadd.f32 %v425_v20, %v388_v22 }
 0x502   :  { %391 = vst [vmem:[#allocation8] sm:$0xff] %v389_v23 }
 0x503   :  { %402 = dma.vmem_to_hbm [thread:$0]  %s398_s29, 128, %s400_s8, [#allocation5]  }
 0x504   :  { %518 = dma.done.wait [#allocation5], 128  }
 0x505   :  { %519 = vsyncadd [#allocation5], 4294967168 }
 0x506   :  { %407 = vsyncpa [#allocation4], 1 }
 0x507   :  { %408 = vsyncpa [#allocation7], 1 }
 0x508   :  { %409 = vsyncpa [#allocation5], 1 }

</bundles_post_ra>
